<compile_context>
chip_gen: v7x
topology: tpu7x:2x2x1
jax: 0.10.0
libtpu: 0.0.40
codegen_flags: <defaults>
</compile_context>

<pallas_src>
import jax
import jax.numpy as jnp
from jax.experimental import pallas as pl
from jax.experimental.pallas import tpu as pltpu


def _copy_kernel(x_ref, o_ref):
    # Straight VMEM copy of the current lane-dense tile.
    o_ref[...] = x_ref[...]


def _pick_batch_tile(B: int) -> int:
    """Row-tile: multiple of 8 when possible, else the full batch dim."""
    if B % 8 != 0:
        return B  # full-dim block satisfies the (8,128) rule
    for tb in (128, 64, 32, 16, 8):
        if B % tb == 0:
            return tb
    return 8


def _pick_feature_tile(feat: int, row_bytes: int) -> int:
    """Lane-dense (128-multiple) feature tile sized for scoped VMEM."""
    if feat % 128 != 0:
        return feat  # full-dim block satisfies the (8,128) rule
    # Keep tile bytes <= ~2 MiB so double-buffered input + output (~4x live)
    # stays far below the smallest scoped-VMEM default (v5e: 16 MiB).
    max_tile_bytes = 2 * 1024 * 1024
    for tf in (4096, 2048, 1024, 512, 256, 128):
        if feat % tf == 0 and tf * row_bytes <= max_tile_bytes:
            return tf
    return 128


def _pallas_identity_copy(x_flat):
    B, feat = x_flat.shape
    itemsize = jnp.dtype(x_flat.dtype).itemsize
    tb = _pick_batch_tile(B)
    tf = _pick_feature_tile(feat, tb * itemsize)
    grid = (pl.cdiv(B, tb), pl.cdiv(feat, tf))

    return pl.pallas_call(
        _copy_kernel,
        out_shape=jax.ShapeDtypeStruct((B, feat), x_flat.dtype),
        grid=grid,
        in_specs=[pl.BlockSpec((tb, tf), lambda i, j: (i, j))],
        out_specs=pl.BlockSpec((tb, tf), lambda i, j: (i, j)),
        # Alias output onto the input buffer: no second (B, feat) allocation.
        input_output_aliases={0: 0},
        compiler_params=pltpu.CompilerParams(
            # Fully independent tiles -> shard across v7x's two TensorCores.
            dimension_semantics=("parallel", "parallel"),
        ),
        cost_estimate=pl.CostEstimate(
            flops=0,
            transcendentals=0,
            bytes_accessed=2 * B * feat * itemsize,
        ),
    )(x_flat)


def reshape_forward(x, param, *, use_pallas=True):
    """Equivalent of torch `x.view(x.size(0), *param)` for contiguous x.

    use_pallas=False is the recommended zero-cost path (metadata-only reshape).
    use_pallas=True routes the data through the tiled Pallas identity-copy
    kernel (e.g. as a fusion anchor).
    """
    B = x.shape[0]
    feat = 1
    for d in x.shape[1:]:
        feat *= d
    target_feat = 1
    for d in param:
        target_feat *= d
    if feat != target_feat:
        raise ValueError("view() size mismatch")

    if not use_pallas:
        # Metadata-only: the single biggest perf win is to not move any data.
        return jnp.reshape(x, (B, *param))

    # Flatten to (B, feat) — same row-major element order as torch .view on a
    # contiguous tensor.
    x_flat = x.reshape(B, feat)
    out_flat = _pallas_identity_copy(x_flat)
    # Metadata-only reshape to the requested view shape.
    return out_flat.reshape((B, *param))


if __name__ == "__main__":
    # NCHW conv-style input: (2, 4, 16, 16); param = (8, 128) since
    # 4*16*16 == 1024 == 8*128, so the view is valid.
    key = jax.random.PRNGKey(0)
    x = jax.random.normal(key, (2, 4, 16, 16), dtype=jnp.float32)
    param = (8, 128)

    fwd = jax.jit(lambda a: reshape_forward(a, param, use_pallas=True))
    y = jax.block_until_ready(fwd(x))

    # Reference: plain JAX reshape (== torch .view semantics for contiguous x).
    ref = x.reshape(x.shape[0], *param)
    assert y.shape == (2, 8, 128)
    assert y.dtype == x.dtype
    assert jnp.array_equal(y, ref)

    # Also exercise the zero-cost metadata path.
    y2 = jax.block_until_ready(reshape_forward(x, param, use_pallas=False))
    assert jnp.array_equal(y2, ref)

    print("KERNEL_OK")
</pallas_src>

<mosaic_0001>
module attributes {stable_mosaic.version = 11 : i64} {
  func.func @_copy_kernel(%arg0: i32, %arg1: i32, %arg2: memref<2x1024xf32, #tpu.memory_space<vmem>>, %arg3: memref<2x1024xf32, #tpu.memory_space<vmem>>) attributes {dimension_semantics = [#tpu.dimension_semantics<parallel>, #tpu.dimension_semantics<parallel>], iteration_bounds = array<i64: 1, 1>, scalar_prefetch = 0 : i64, scratch_operands = 0 : i64, tpu.core_type = #tpu.core_type<tc>, window_params = [{transform_indices = @transform_0, window_bounds = array<i64: 2, 1024>}, {transform_indices = @transform_1, window_bounds = array<i64: 2, 1024>}]} {
    %c0 = arith.constant 0 : index
    %c0_0 = arith.constant 0 : index
    %0 = vector.load %arg2[%c0, %c0_0] : memref<2x1024xf32, #tpu.memory_space<vmem>>, vector<2x1024xf32>
    %c0_1 = arith.constant 0 : index
    %c0_2 = arith.constant 0 : index
    %1 = vector.load %arg3[%c0_1, %c0_2] : memref<2x1024xf32, #tpu.memory_space<vmem>>, vector<2x1024xf32>
    tpu.vector_store %arg3[%c0_1, %c0_2], %0 {strides = array<i32>} : memref<2x1024xf32, #tpu.memory_space<vmem>>, vector<2x1024xf32>,
    return
  }
  func.func @transform_0(%arg0: i32, %arg1: i32) -> (i32, i32) {
    %c0_i32 = arith.constant 0 : i32
    return %arg0, %arg1 : i32, i32
  }
  func.func @transform_1(%arg0: i32, %arg1: i32) -> (i32, i32) {
    %c0_i32 = arith.constant 0 : i32
    return %arg0, %arg1 : i32, i32
  }
}

</mosaic_0001>

<bundles_post_ra>
// kernel: _lambda_.1
= control target key start
LH: loop header
LB: loop body
LE: loop exit
PB: predicated region body
PF: predicated region fallthrough
CT: control target
= control target key end

     0   :  { %s38_s0 = inlined_call_operand.vmem [shape: f32[2,1024], index: 0, kind: input, shape index: {}, may-alias: {0,1}]   ;;  %s39_s1 = inlined_call_operand.vmem [shape: f32[2,1024], index: 1, kind: output, shape index: {}, may-alias: {0,1}]  }
   0x1   :  { %v8_v0 = vld [vmem:[%s38_s0] sm:$0xff]  ;;  %v9_v1 = vld [vmem:[%s38_s0 + $0x8] sm:$0xff] }
   0x2   :  { %10 = vst [vmem:[%s39_s1] sm:$0xff] %v8_v0  ;;  %11 = vst [vmem:[%s39_s1 + $0x8] sm:$0xff] %v9_v1 }

</bundles_post_ra>
